<compile_context>
chip_gen: v5e
topology: v5e:2x2
jax: 0.10.0
libtpu: 0.0.40
codegen_flags: <defaults>
</compile_context>

<pallas_src>
import jax
import jax.numpy as jnp
from jax.experimental import pallas as pl
from jax.experimental.pallas import tpu as pltpu


def gcn_kernel(adj_ref, x_ref, w1_ref, b1_ref, w2t_ref, b2_ref, out_ref):
    # adj_ref : (N, N)   normalized adjacency (resident across grid steps)
    # x_ref   : (N, TB)  node features (F_in=1) of TB graphs, batch on lanes
    # w1_ref  : (H, 1)   GCNConv weight column (F_in = 1)
    # b1_ref  : (H, 1)   GCNConv bias (added after aggregation)
    # w2t_ref : (C, H)   classifier weight, pre-transposed
    # b2_ref  : (C, 1)   classifier bias
    # out_ref : (C, TB)  logits, batch on lanes
    # Aggregate first: one lane-dense MXU matmul (11,11) x (11,TB).
    ax = jnp.dot(adj_ref[...], x_ref[...],
                 preferred_element_type=jnp.float32)          # (N, TB)
    # F_in == 1: W1 transform is an outer product -> VPU broadcast multiply,
    # fused with bias add and ReLU (keeps the MXU/vex slot free).
    w1 = w1_ref[...]                                          # (H, 1)
    b1 = b1_ref[...]                                          # (H, 1)
    h = ax[:, None, :] * w1[None, :, :] + b1[None, :, :]      # (N, H, TB)
    h = jnp.maximum(h, 0.0)                                   # ReLU
    m = jnp.mean(h, axis=0)                                   # (H, TB) node mean
    out = jnp.dot(w2t_ref[...], m,
                  preferred_element_type=jnp.float32)         # (C, TB)
    out_ref[...] = out + b2_ref[...]


def gcn_forward(adj_hat, x, w1, b1, w2, b2, *, tb=256):
    """x: (B, N, 1); w1: (1, H); b1: (H,); w2: (H, C); b2: (C,) -> (B, C)."""
    B, N, F = x.shape
    assert F == 1, "module's forward implies a single node feature"
    H = w1.shape[1]
    C = w2.shape[1]

    # Batch on the lane axis, zero-padded to a multiple of TB (TB is a multiple
    # of 256 -> fills the 256-wide MXU on v6e/v7x and tiles 128 lanes on v5e).
    n_blocks = pl.cdiv(B, tb)
    bp = n_blocks * tb
    x_t = jnp.zeros((N, bp), jnp.float32).at[:, :B].set(
        jnp.transpose(x[:, :, 0]).astype(jnp.float32))

    w1_col = jnp.transpose(w1).astype(jnp.float32)            # (H, 1)
    b1_col = jnp.reshape(b1, (H, 1)).astype(jnp.float32)      # (H, 1)
    w2_t = jnp.transpose(w2).astype(jnp.float32)              # (C, H)
    b2_col = jnp.reshape(b2, (C, 1)).astype(jnp.float32)      # (C, 1)

    out_t = pl.pallas_call(
        gcn_kernel,
        out_shape=jax.ShapeDtypeStruct((C, bp), jnp.float32),
        grid_spec=pl.GridSpec(
            grid=(n_blocks,),
            in_specs=[
                pl.BlockSpec((N, N), lambda i: (0, 0)),       # adj_hat (resident)
                pl.BlockSpec((N, tb), lambda i: (0, i)),      # x slab, batch on lanes
                pl.BlockSpec((H, 1), lambda i: (0, 0)),       # w1 (resident)
                pl.BlockSpec((H, 1), lambda i: (0, 0)),       # b1 (resident)
                pl.BlockSpec((C, H), lambda i: (0, 0)),       # w2^T (resident)
                pl.BlockSpec((C, 1), lambda i: (0, 0)),       # b2 (resident)
            ],
            out_specs=pl.BlockSpec((C, tb), lambda i: (0, i)),  # lane-dense output
        ),
        compiler_params=pltpu.CompilerParams(
            dimension_semantics=("parallel",)),
    )(adj_hat, x_t, w1_col, b1_col, w2_t, b2_col)

    # Back to the module's (B, C) layout; drop padded columns.
    return jnp.transpose(out_t)[:B, :]


def build_normalized_adjacency(adj, batch_size):
    """gcn_norm of edge_index = nonzero(adj) repeated `batch_size` times,
    with added self loops (fill 1) and symmetric normalization."""
    N = adj.shape[0]
    M = batch_size * adj.astype(jnp.float32) + jnp.eye(N, dtype=jnp.float32)
    deg = jnp.sum(M, axis=0)                     # in-degree (scatter on target/col)
    d_inv_sqrt = jnp.where(deg > 0, 1.0 / jnp.sqrt(deg), 0.0)
    # out[i] = sum_j d[j]^-1/2 * M[j,i] * d[i]^-1/2 * x[j] -> A_hat = D^-1/2 M^T D^-1/2
    return d_inv_sqrt[:, None] * M.T * d_inv_sqrt[None, :]


def reference_forward(adj_hat, x, w1, b1, w2, b2):
    hp = jnp.einsum("bnf,fh->bnh", x, w1, precision=jax.lax.Precision.HIGHEST)
    h = jnp.einsum("nm,bmh->bnh", adj_hat, hp, precision=jax.lax.Precision.HIGHEST)
    h = jnp.maximum(h + b1, 0.0)
    m = jnp.mean(h, axis=1)
    return jnp.dot(m, w2, precision=jax.lax.Precision.HIGHEST) + b2


if __name__ == "__main__":
    # Small deterministic problem: B=2 graphs, N=11 nodes (module reshapes to
    # (len(batch), 11, 1)), hidden=32, num_classes=4.
    B, N, F_in, hidden, num_classes = 2, 11, 1, 32, 4

    # Deterministic symmetric adjacency: ring + two chords, no self loops.
    adj = jnp.zeros((N, N), dtype=jnp.float32)
    for i in range(N):
        j = (i + 1) % N
        adj = adj.at[i, j].set(1.0).at[j, i].set(1.0)
    adj = adj.at[0, 5].set(1.0).at[5, 0].set(1.0)
    adj = adj.at[2, 8].set(1.0).at[8, 2].set(1.0)

    adj_hat = build_normalized_adjacency(adj, B)

    key = jax.random.PRNGKey(0)
    k_x, k_w1, k_b1, k_w2, k_b2 = jax.random.split(key, 5)
    x = jax.random.normal(k_x, (B, N, F_in), dtype=jnp.float32)
    w1 = jax.random.normal(k_w1, (F_in, hidden), dtype=jnp.float32) * 0.5
    b1 = jax.random.normal(k_b1, (hidden,), dtype=jnp.float32) * 0.1
    w2 = jax.random.normal(k_w2, (hidden, num_classes), dtype=jnp.float32) * 0.5
    b2 = jax.random.normal(k_b2, (num_classes,), dtype=jnp.float32) * 0.1

    out = gcn_forward(adj_hat, x, w1, b1, w2, b2)
    out = jax.block_until_ready(out)

    ref = reference_forward(adj_hat, x, w1, b1, w2, b2)
    assert out.shape == (B, num_classes)
    assert jnp.allclose(out, ref, atol=1e-4, rtol=1e-4), (out, ref)

    print("KERNEL_OK")
</pallas_src>

<mosaic_0001>
module attributes {stable_mosaic.version = 11 : i64} {
  func.func @gcn_kernel(%arg0: i32, %arg1: memref<11x11xf32, #tpu.memory_space<vmem>>, %arg2: memref<11x256xf32, #tpu.memory_space<vmem>>, %arg3: memref<32x1xf32, #tpu.memory_space<vmem>>, %arg4: memref<32x1xf32, #tpu.memory_space<vmem>>, %arg5: memref<4x32xf32, #tpu.memory_space<vmem>>, %arg6: memref<4x1xf32, #tpu.memory_space<vmem>>, %arg7: memref<4x256xf32, #tpu.memory_space<vmem>>) attributes {dimension_semantics = [#tpu.dimension_semantics<parallel>], iteration_bounds = array<i64: 1>, scalar_prefetch = 0 : i64, scratch_operands = 0 : i64, tpu.core_type = #tpu.core_type<tc>, window_params = [{pipeline_mode = #tpu.pipeline_mode<synchronous>, transform_indices = @transform_0, window_bounds = array<i64: 11, 11>}, {transform_indices = @transform_1, window_bounds = array<i64: 11, 256>}, {pipeline_mode = #tpu.pipeline_mode<synchronous>, transform_indices = @transform_2, window_bounds = array<i64: 32, 1>}, {pipeline_mode = #tpu.pipeline_mode<synchronous>, transform_indices = @transform_3, window_bounds = array<i64: 32, 1>}, {pipeline_mode = #tpu.pipeline_mode<synchronous>, transform_indices = @transform_4, window_bounds = array<i64: 4, 32>}, {pipeline_mode = #tpu.pipeline_mode<synchronous>, transform_indices = @transform_5, window_bounds = array<i64: 4, 1>}, {transform_indices = @transform_6, window_bounds = array<i64: 4, 256>}]} {
    %c0 = arith.constant 0 : index
    %c0_0 = arith.constant 0 : index
    %0 = vector.load %arg1[%c0, %c0_0] : memref<11x11xf32, #tpu.memory_space<vmem>>, vector<11x11xf32>
    %c0_1 = arith.constant 0 : index
    %c0_2 = arith.constant 0 : index
    %1 = vector.load %arg2[%c0_1, %c0_2] : memref<11x256xf32, #tpu.memory_space<vmem>>, vector<11x256xf32>
    %cst = arith.constant dense<0.000000e+00> : vector<11x256xf32>
    %2 = tpu.matmul %0, %1, %cst {dimension_numbers = #tpu.dot_dimension_numbers<[1], [0], [0], [1], [0, 0, 1, 1], [], []>} : vector<11x11xf32>, vector<11x256xf32>, vector<11x256xf32> -> vector<11x256xf32>
    %c0_3 = arith.constant 0 : index
    %c0_4 = arith.constant 0 : index
    %3 = vector.load %arg3[%c0_3, %c0_4] : memref<32x1xf32, #tpu.memory_space<vmem>>, vector<32x1xf32>
    %c0_5 = arith.constant 0 : index
    %c0_6 = arith.constant 0 : index
    %4 = vector.load %arg4[%c0_5, %c0_6] : memref<32x1xf32, #tpu.memory_space<vmem>>, vector<32x1xf32>
    %5 = vector.shape_cast %2 : vector<11x256xf32> to vector<11x1x256xf32>
    %6 = vector.shape_cast %3 : vector<32x1xf32> to vector<1x32x1xf32>
    %7 = vector.broadcast %5 : vector<11x1x256xf32> to vector<11x32x256xf32>
    %8 = vector.broadcast %6 : vector<1x32x1xf32> to vector<11x32x256xf32>
    %9 = arith.mulf %7, %8 : vector<11x32x256xf32>
    %10 = vector.shape_cast %4 : vector<32x1xf32> to vector<1x32x1xf32>
    %11 = vector.broadcast %10 : vector<1x32x1xf32> to vector<11x32x256xf32>
    %12 = arith.addf %9, %11 : vector<11x32x256xf32>
    %cst_7 = arith.constant 0.000000e+00 : f32
    %13 = vector.broadcast %cst_7 : f32 to vector<11x32x256xf32>
    %14 = arith.maximumf %12, %13 : vector<11x32x256xf32>
    %cst_8 = arith.constant dense<0.000000e+00> : vector<32x256xf32>
    %15 = vector.multi_reduction <add>, %14, %cst_8 [0] : vector<11x32x256xf32> to vector<32x256xf32>
    %cst_9 = arith.constant 1.100000e+01 : f32
    %16 = vector.broadcast %cst_9 : f32 to vector<32x256xf32>
    %17 = arith.divf %15, %16 : vector<32x256xf32>
    %c0_10 = arith.constant 0 : index
    %c0_11 = arith.constant 0 : index
    %18 = vector.load %arg5[%c0_10, %c0_11] : memref<4x32xf32, #tpu.memory_space<vmem>>, vector<4x32xf32>
    %cst_12 = arith.constant dense<0.000000e+00> : vector<4x256xf32>
    %19 = tpu.matmul %18, %17, %cst_12 {dimension_numbers = #tpu.dot_dimension_numbers<[1], [0], [0], [1], [0, 0, 1, 1], [], []>} : vector<4x32xf32>, vector<32x256xf32>, vector<4x256xf32> -> vector<4x256xf32>
    %c0_13 = arith.constant 0 : index
    %c0_14 = arith.constant 0 : index
    %20 = vector.load %arg6[%c0_13, %c0_14] : memref<4x1xf32, #tpu.memory_space<vmem>>, vector<4x1xf32>
    %21 = vector.broadcast %20 : vector<4x1xf32> to vector<4x256xf32>
    %22 = arith.addf %19, %21 : vector<4x256xf32>
    %c0_15 = arith.constant 0 : index
    %c0_16 = arith.constant 0 : index
    %23 = vector.load %arg7[%c0_15, %c0_16] : memref<4x256xf32, #tpu.memory_space<vmem>>, vector<4x256xf32>
    tpu.vector_store %arg7[%c0_15, %c0_16], %22 {strides = array<i32>} : memref<4x256xf32, #tpu.memory_space<vmem>>, vector<4x256xf32>,
    return
  }
  func.func @transform_0(%arg0: i32) -> (i32, i32) {
    %c0_i32 = arith.constant 0 : i32
    %c0_i32_0 = arith.constant 0 : i32
    %c0_i32_1 = arith.constant 0 : i32
    return %c0_i32, %c0_i32_0 : i32, i32
  }
  func.func @transform_1(%arg0: i32) -> (i32, i32) {
    %c0_i32 = arith.constant 0 : i32
    %c0_i32_0 = arith.constant 0 : i32
    return %c0_i32, %arg0 : i32, i32
  }
  func.func @transform_2(%arg0: i32) -> (i32, i32) {
    %c0_i32 = arith.constant 0 : i32
    %c0_i32_0 = arith.constant 0 : i32
    %c0_i32_1 = arith.constant 0 : i32
    return %c0_i32, %c0_i32_0 : i32, i32
  }
  func.func @transform_3(%arg0: i32) -> (i32, i32) {
    %c0_i32 = arith.constant 0 : i32
    %c0_i32_0 = arith.constant 0 : i32
    %c0_i32_1 = arith.constant 0 : i32
    return %c0_i32, %c0_i32_0 : i32, i32
  }
  func.func @transform_4(%arg0: i32) -> (i32, i32) {
    %c0_i32 = arith.constant 0 : i32
    %c0_i32_0 = arith.constant 0 : i32
    %c0_i32_1 = arith.constant 0 : i32
    return %c0_i32, %c0_i32_0 : i32, i32
  }
  func.func @transform_5(%arg0: i32) -> (i32, i32) {
    %c0_i32 = arith.constant 0 : i32
    %c0_i32_0 = arith.constant 0 : i32
    %c0_i32_1 = arith.constant 0 : i32
    return %c0_i32, %c0_i32_0 : i32, i32
  }
  func.func @transform_6(%arg0: i32) -> (i32, i32) {
    %c0_i32 = arith.constant 0 : i32
    %c0_i32_0 = arith.constant 0 : i32
    return %c0_i32, %arg0 : i32, i32
  }
}

</mosaic_0001>

<bundles_post_ra>
// kernel: tpu_custom_call.1
= control target key start
LH: loop header
LB: loop body
LE: loop exit
PB: predicated region body
PF: predicated region fallthrough
CT: control target
= control target key end

     0   :  { %vm37_vm0 = vcmask 1042432   ;;  %v691_v3 = vmov 0   ;;  %vm30_vm1 = vcmask 89088   ;;  %s1193_s0 = inlined_call_operand.vmem [shape: f32[11,11], index: 0, kind: input, shape index: {}]   ;;  %s1194_s1 = inlined_call_operand.vmem [shape: f32[11,256], index: 1, kind: input, shape index: {}]   ;;  %s1195_s2 = inlined_call_operand.vmem [shape: f32[32,1], index: 2, kind: input, shape index: {}]   ;;  %s1196_s3 = inlined_call_operand.vmem [shape: f32[32,1], index: 3, kind: input, shape index: {}]   ;;  %s1197_s4 = inlined_call_operand.vmem [shape: f32[4,32], index: 4, kind: input, shape index: {}]   ;;  %s1198_s5 = inlined_call_operand.vmem [shape: f32[4,1], index: 5, kind: input, shape index: {}]   ;;  %s1199_s6 = inlined_call_operand.hbm [shape: f32[4,256], index: 6, kind: output, shape index: {}]  }
   0x1   :  { %v29_v0 = vld [vmem:[%s1194_s1 + $0x18] sm:$0x7]  ;;  %661 = vset.pattern.permute.xlu1 %v691_v3  ;;  %660 = vset.pattern.permute.xlu0 %v691_v3  ;;  %v28_v4 = vld [vmem:[%s1194_s1 + $0x10] sm:$0x7]  ;;  %v27_v5 = vld [vmem:[%s1194_s1 + $0x8] sm:$0xff] }
   0x2   :  { %v97_v1 = vld [vmem:[%s1196_s3 + $0x18] sm:$0xff]  ;;  %652 = vmatpush.msk.msra.mxu1 %vm37_vm0, %v29_v0  ;;  %v24_v6 = vld [vmem:[%s1193_s0] sm:$0xff]  ;;  %649 = vmatpush.msk.msra.mxu0 %vm37_vm0, %v28_v4  ;;  %v96_v8 = vld [vmem:[%s1196_s3 + $0x10] sm:$0xff] }
   0x3   :  { %v93_v2 = vld [vmem:[%s1195_s2 + $0x18] sm:$0xff]  ;;  %301 = vperm.xlu1 %661, %v97_v1   ;;  %v26_v7 = vld [vmem:[%s1194_s1] sm:$0xff]  ;;  %662 = vset.pattern.permute.xlu2 %v691_v3 }
   0x4   :  { %193 = vperm.xlu0 %660, %v93_v2   ;;  %82 = vmatpush.msra.mxu1 %v27_v5 }
   0x5   :  { %653 = vmatmul.msk.f32.vlgmr.msra.gmra.mxu1 %vm30_vm1, %v24_v6  ;;  %59 = vmatpush.msra.mxu0 %v26_v7 }
   0x6   :  { %11 = vsyncpa [#allocation3], 0  ;;  %650 = vmatmul.msk.f32.vlgmr.msra.gmra.mxu0 %vm30_vm1, %v24_v6  ;;  %296 = vperm.xlu2 %662, %v96_v8   ;;  %v91_v9 = vld [vmem:[%s1195_s2 + $0x8] sm:$0xff]  ;;  %v92_v10 = vld [vmem:[%s1195_s2 + $0x10] sm:$0xff]  ;;  %vm112_vm2 = vcmask 1043459   ;;  %vm115_vm3 = vcmask 1044484  }
   0x7   :  { %v25_v11 = vld [vmem:[%s1193_s0 + $0x8] sm:$0x7]  ;;  %v90_v12 = vld [vmem:[%s1195_s2] sm:$0xff]  ;;  %vm118_vm4 = vcmask 1045509   ;;  %vm121_vm5 = vcmask 1046534   ;;  %vm124_vm6 = vcmask 1046528  }
   0x8   :  { %v94_v13 = vld [vmem:[%s1196_s3] sm:$0xff]  ;;  %v95_v14 = vld [vmem:[%s1196_s3 + $0x8] sm:$0xff]  ;;  %vm106_vm7 = vcmask 1041409   ;;  %vm109_vm8 = vcmask 1042434   ;;  %vm104_vm9 = vcmask 1040384   ;;  %vm582_vm11 = vcmask 261120  }
   0x9   :  { %v576_v15 = vld [vmem:[%s1198_s5] sm:$0xf]  ;;  %s693_s5 = smov [#allocation2]   ;;  %s640_s27 = sshll.u32 %s1199_s6, 4  ;;  %vm629_vm12 = vcmask 1043456   ;;  %s641_s27 = int_to_ptr.hbm [resolvable:$true] %s640_s27 }
   0xa   :  { %s638_s25 = sshll.u32 %s693_s5, 4  ;;  %s639_s25 = int_to_ptr.vmem [resolvable:$true] %s638_s25 }
   0xb   :  { %183 = vperm.xlu1 %661, %v91_v9  }
   0xc   :  { %188 = vperm.xlu0 %660, %v92_v10  }
   0xd   :  { %654 = vmatmul.msk.f32.gmra.mxu1 %vm30_vm1, %v25_v11 }
   0xe   :  { %651 = vmatmul.msk.f32.gmra.mxu0 %vm30_vm1, %v25_v11  ;;  %178 = vperm.xlu2 %662, %v90_v12  }
  0x13   :  { %286 = vperm.xlu1 %661, %v94_v13  }
  0x14   :  { %291 = vperm.xlu0 %660, %v95_v14  }
  0x16   :  { %579 = vperm.xlu2 %662, %v576_v15  }
  0x60   :  { %v782_v23 = vpop.permute.xlu2 %296 }
  0x68   :  { %v821_v59 = vpop.permute.xlu2 %178 }
  0x75   :  { %v778_v19 = vpop.permute.xlu1 %301 }
  0x76   :  { %v780_v21 = vpop.permute.xlu0 %193 }
  0x7d   :  { %v802_v49 = vpop.permute.xlu1 %183 }
  0x7e   :  { %v809_v54 = vpop.permute.xlu0 %188 }
  0x82   :  { %v84_v16 = vpop.f32.mrf.mxu1 }
  0x83   :  { %v102_v17 = vrot.slane %v84_v16, 7  ;;  %v61_v18 = vpop.f32.mrf.mxu0 }
  0x85   :  { %v113_v20 = vsel %vm112_vm2, %v61_v18, %v102_v17  ;;  %v116_v22 = vsel %vm115_vm3, %v61_v18, %v102_v17  ;;  %v119_v24 = vsel %vm118_vm4, %v61_v18, %v102_v17  ;;  %v122_v26 = vsel %vm121_vm5, %v61_v18, %v102_v17 }
  0x86   :  { %v114_v25 = vrot.slane %v113_v20, 3  ;;  %v117_v27 = vrot.slane %v116_v22, 4  ;;  %v784_v28 = vsel %vm124_vm6, %v102_v17, %v61_v18  ;;  %v120_v30 = vrot.slane %v119_v24, 5 }
  0x87   :  { %v107_v33 = vsel %vm106_vm7, %v61_v18, %v102_v17  ;;  %v110_v34 = vsel %vm109_vm8, %v61_v18, %v102_v17  ;;  %v123_v35 = vrot.slane %v122_v26, 6  ;;  %v105_v36 = vsel %vm104_vm9, %v61_v18, %v102_v17 }
  0x88   :  { %v1200_v37 = vrot.slane %v784_v28, 7  ;;  %v790_v38 = vperm.slane %v114_v25, 0  ;;  %v792_v39 = vperm.slane %v114_v25, 1  ;;  %v795_v41 = vperm.slane %v117_v27, 0 }
  0x89   :  { %v108_v42 = vrot.slane %v107_v33, 1  ;;  %v111_v43 = vrot.slane %v110_v34, 2  ;;  %v798_v45 = vperm.slane %v117_v27, 1  ;;  %v800_v46 = vperm.slane %v120_v30, 0 }
  0x8a   :  { %v87_v29 = vpop.f32.mrf.mxu1  ;;  %v132_v47 = vperm.slane %v105_v36, 0  ;;  %v133_v48 = vperm.slane %v105_v36, 1  ;;  %v804_v50 = vperm.slane %v120_v30, 1  ;;  %v806_v51 = vperm.slane %v123_v35, 0 }
  0x8b   :  { %v103_v31 = vrot.slane %v87_v29, 7  ;;  %v64_v32 = vpop.f32.mrf.mxu0  ;;  %v811_v55 = vperm.slane %v123_v35, 1  ;;  %v815_v57 = vperm.slane %v1200_v37, 0  ;;  %v819_v58 = vmul.f32 %v780_v21, %v790_v38 }
  0x8c   :  { %v134_v60 = vperm.slane %v108_v42, 0  ;;  %v135_v61 = vperm.slane %v108_v42, 1  ;;  %v136_v62 = vperm.slane %v111_v43, 0  ;;  %v137_v63 = vperm.slane %v111_v43, 1 }
  0x8d   :  { %v128_v40 = vsel %vm106_vm7, %v64_v32, %v103_v31  ;;  %v130_v44 = vsel %vm109_vm8, %v64_v32, %v103_v31  ;;  %v127_v52 = vsel %vm104_vm9, %v64_v32, %v103_v31  ;;  %v196_v2 = vmul.f32 %v821_v59, %v132_v47  ;;  %v857_v32 = vpop.permute.xlu1 %286 }
  0x8e   :  { %v129_v53 = vrot.slane %v128_v40, 1  ;;  %v131_v56 = vrot.slane %v130_v44, 2  ;;  %v823_v0 = vperm.slane %v127_v52, 0  ;;  %v825_v1 = vperm.slane %v127_v52, 1  ;;  %1205 = vst [vmem:[#allocation5_spill] sm:$0xff] %v857_v32  ;;  %v869_v40 = vpop.permute.xlu0 %291 }
  0x8f   :  { %v197_v3 = vmul.f32 %v821_v59, %v133_v48  ;;  %v198_v5 = vmul.f32 %v802_v49, %v132_v47  ;;  %v199_v6 = vmul.f32 %v802_v49, %v133_v48  ;;  %v200_v7 = vmul.f32 %v809_v54, %v132_v47 }
  0x90   :  { %v829_v4 = vperm.slane %v129_v53, 0  ;;  %v834_v8 = vperm.slane %v129_v53, 1  ;;  %v836_v9 = vperm.slane %v131_v56, 0  ;;  %v838_v10 = vperm.slane %v131_v56, 1 }
  0x91   :  { %v201_v11 = vmul.f32 %v809_v54, %v133_v48  ;;  %v202_v12 = vmul.f32 %v780_v21, %v132_v47  ;;  %v203_v13 = vmul.f32 %v780_v21, %v133_v48  ;;  %v204_v14 = vmul.f32 %v821_v59, %v134_v60 }
  0x92   :  { %v205_v15 = vmul.f32 %v821_v59, %v135_v61  ;;  %v206_v16 = vmul.f32 %v802_v49, %v134_v60  ;;  %v207_v17 = vmul.f32 %v802_v49, %v135_v61  ;;  %v208_v18 = vmul.f32 %v809_v54, %v134_v60 }
  0x93   :  { %v209_v20 = vmul.f32 %v809_v54, %v135_v61  ;;  %v210_v22 = vmul.f32 %v780_v21, %v134_v60  ;;  %v211_v24 = vmul.f32 %v780_v21, %v135_v61  ;;  %v212_v25 = vmul.f32 %v821_v59, %v136_v62 }
  0x94   :  { %v213_v26 = vmul.f32 %v821_v59, %v137_v63  ;;  %v214_v27 = vmul.f32 %v802_v49, %v136_v62  ;;  %v215_v29 = vmul.f32 %v802_v49, %v137_v63  ;;  %v216_v30 = vmul.f32 %v809_v54, %v136_v62 }
  0x95   :  { %v217_v31 = vmul.f32 %v809_v54, %v137_v63  ;;  %v218_v33 = vmul.f32 %v780_v21, %v136_v62  ;;  %v219_v34 = vmul.f32 %v780_v21, %v137_v63  ;;  %v863_v35 = vmul.f32 %v821_v59, %v823_v0 }
  0x96   :  { %v867_v36 = vmul.f32 %v802_v49, %v823_v0  ;;  %v873_v42 = vmul.f32 %v802_v49, %v825_v1  ;;  %v877_v43 = vmul.f32 %v809_v54, %v823_v0  ;;  %v881_v44 = vmul.f32 %v809_v54, %v825_v1 }
  0x97   :  { %1206 = vst [vmem:[#allocation6_spill] sm:$0xff] %v863_v35  ;;  %v304_v47 = vadd.f32 %v857_v32, %v196_v2  ;;  %v305_v48 = vadd.f32 %v857_v32, %v197_v3  ;;  %v886_v52 = vadd.f32 %v869_v40, %v198_v5  ;;  %v889_v53 = vadd.f32 %v869_v40, %v199_v6 }
  0x98   :  { %1207 = vst [vmem:[#allocation7_spill] sm:$0xff] %v873_v42  ;;  %v892_v56 = vadd.f32 %v782_v23, %v200_v7  ;;  %v895_v60 = vadd.f32 %v782_v23, %v201_v11  ;;  %v310_v61 = vadd.f32 %v778_v19, %v202_v12  ;;  %v899_v62 = vadd.f32 %v778_v19, %v203_v13 }
  0x99   :  { %v312_v63 = vadd.f32 %v857_v32, %v204_v14  ;;  %v313_v2 = vadd.f32 %v857_v32, %v205_v15  ;;  %v904_v3 = vadd.f32 %v869_v40, %v206_v16  ;;  %v907_v5 = vadd.f32 %v869_v40, %v207_v17 }
  0x9a   :  { %v910_v6 = vadd.f32 %v782_v23, %v208_v18  ;;  %v913_v7 = vadd.f32 %v782_v23, %v209_v20  ;;  %v318_v11 = vadd.f32 %v778_v19, %v210_v22  ;;  %v319_v12 = vadd.f32 %v778_v19, %v211_v24 }
  0x9b   :  { %v918_v13 = vadd.f32 %v857_v32, %v212_v25  ;;  %v921_v14 = vadd.f32 %v857_v32, %v213_v26  ;;  %v924_v15 = vadd.f32 %v869_v40, %v214_v27  ;;  %v927_v16 = vadd.f32 %v869_v40, %v215_v29 }
  0x9c   :  { %v930_v17 = vadd.f32 %v782_v23, %v216_v30  ;;  %v933_v18 = vadd.f32 %v782_v23, %v217_v31  ;;  %v326_v20 = vadd.f32 %v778_v19, %v218_v33  ;;  %v937_v22 = vadd.f32 %v778_v19, %v219_v34 }
  0x9d   :  { %1208 = vst [vmem:[#allocation8_spill] sm:$0xff] %v918_v13  ;;  %v392_v24 = vmax.f32 %v304_v47, 0.0  ;;  %v393_v25 = vmax.f32 %v305_v48, 0.0  ;;  %v394_v26 = vmax.f32 %v886_v52, 0.0  ;;  %v396_v29 = vmax.f32 %v892_v56, 0.0 }
  0x9e   :  { %1209 = vst [vmem:[#allocation9_spill] sm:$0xff] %v921_v14  ;;  %v398_v30 = vmax.f32 %v310_v61, 0.0  ;;  %v399_v35 = vmax.f32 %v899_v62, 0.0  ;;  %v406_v31 = vmax.f32 %v318_v11, 0.0  ;;  %v400_v42 = vmax.f32 %v312_v63, 0.0 }
  0x9f   :  { %v401_v32 = vmax.f32 %v313_v2, 0.0  ;;  %v402_v33 = vmax.f32 %v904_v3, 0.0  ;;  %v404_v47 = vmax.f32 %v910_v6, 0.0  ;;  %v407_v52 = vmax.f32 %v319_v12, 0.0 }
  0xa0   :  { %v234_v56 = vmul.f32 %v780_v21, %v795_v41  ;;  %v242_v63 = vmul.f32 %v780_v21, %v800_v46  ;;  %v540_v6 = vadd.f32 %v406_v31, %v398_v30  ;;  %v334_v11 = vadd.f32 %v778_v19, %v819_v58 }
  0xa1   :  { %v414_v48 = vmax.f32 %v326_v20, 0.0  ;;  %v250_v37 = vmul.f32 %v780_v21, %v806_v51  ;;  %v258_v61 = vmul.f32 %v780_v21, %v815_v57  ;;  %v415_v62 = vmax.f32 %v937_v22, 0.0 }
  0xa2   :  { %v266_v2 = vmul.f32 %v780_v21, %v823_v0  ;;  %v274_v30 = vmul.f32 %v780_v21, %v829_v4  ;;  %v342_v31 = vadd.f32 %v778_v19, %v234_v56  ;;  %v970_v58 = vadd.f32 %v400_v42, %v392_v24 }
  0xa3   :  { %v972_v12 = vadd.f32 %v401_v32, %v393_v25  ;;  %v282_v20 = vmul.f32 %v780_v21, %v836_v9  ;;  %v350_v34 = vadd.f32 %v778_v19, %v242_v63  ;;  %v422_v27 = vmax.f32 %v334_v11, 0.0 }
  0xa4   :  { %1210 = vst [vmem:[#allocation10_spill] sm:$0xff] %v970_v58  ;;  %v541_v3 = vadd.f32 %v540_v6, %v414_v48  ;;  %v227_v22 = vmul.f32 %v780_v21, %v792_v39  ;;  %v358_v0 = vadd.f32 %v778_v19, %v250_v37  ;;  %v366_v14 = vadd.f32 %v778_v19, %v258_v61 }
  0xa5   :  { %1211 = vst [vmem:[#allocation11_spill] sm:$0xff] %v972_v12  ;;  %v692_v13 = vmov 11.0   ;;  %v235_v32 = vmul.f32 %v780_v21, %v798_v45  ;;  %v374_v42 = vadd.f32 %v778_v19, %v266_v2  ;;  %v382_v24 = vadd.f32 %v778_v19, %v274_v30 }
  0xa6   :  { %663 = vrcp.f32 %v692_v13  ;;  %v430_v25 = vmax.f32 %v342_v31, 0.0  ;;  %v542_v56 = vadd.f32 %v541_v3, %v422_v27  ;;  %v550_v63 = vadd.f32 %v407_v52, %v399_v35 }
  0xa7   :  { %v1212_v48 = vrot.slane %v784_v28, 7  ;;  %v243_v37 = vmul.f32 %v780_v21, %v804_v50  ;;  %v335_v61 = vadd.f32 %v778_v19, %v227_v22  ;;  %v992_v13 = vadd.f32 %v402_v33, %v394_v26 }
  0xa8   :  { %v438_v11 = vmax.f32 %v350_v34, 0.0  ;;  %v543_v12 = vadd.f32 %v542_v56, %v430_v25  ;;  %v251_v2 = vmul.f32 %v780_v21, %v811_v55  ;;  %v520_v30 = vadd.f32 %v404_v47, %v396_v29 }
  0xa9   :  { %v987_v6 = vperm.slane %v1212_v48, 1  ;;  %v390_v27 = vadd.f32 %v778_v19, %v282_v20  ;;  %v446_v35 = vmax.f32 %v358_v0, 0.0  ;;  %v343_v28 = vadd.f32 %v778_v19, %v235_v32 }
  0xaa   :  { %v454_v52 = vmax.f32 %v366_v14, 0.0  ;;  %v462_v3 = vmax.f32 %v374_v42, 0.0  ;;  %v470_v31 = vmax.f32 %v382_v24, 0.0  ;;  %v544_v48 = vadd.f32 %v543_v12, %v438_v11 }
  0xab   :  { %v259_v26 = vmul.f32 %v780_v21, %v987_v6  ;;  %v351_v33 = vadd.f32 %v778_v19, %v243_v37  ;;  %v423_v34 = vmax.f32 %v335_v61, 0.0  ;;  %v551_v22 = vadd.f32 %v550_v63, %v415_v62 }
  0xac   :  { %v664_v58 = vpop.eup %663  ;;  %v545_v25 = vadd.f32 %v544_v48, %v446_v35  ;;  %v267_v29 = vmul.f32 %v780_v21, %v825_v1  ;;  %v359_v47 = vadd.f32 %v778_v19, %v251_v2  ;;  %v478_v20 = vmax.f32 %v390_v27, 0.0 }
  0xad   :  { %v561_v56 = vmul.f32 11.0, %v664_v58  ;;  %v431_v14 = vmax.f32 %v343_v28, 0.0  ;;  %v552_v0 = vadd.f32 %v551_v22, %v423_v34  ;;  %v224_v12 = vmul.f32 %v809_v54, %v790_v38 }
  0xae   :  { %v546_v32 = vadd.f32 %v545_v25, %v454_v52  ;;  %v275_v24 = vmul.f32 %v780_v21, %v834_v8  ;;  %v283_v62 = vmul.f32 %v780_v21, %v838_v10  ;;  %v367_v63 = vadd.f32 %v778_v19, %v259_v26 }
  0xaf   :  { %v562_v42 = vsub.f32 1.0, %v561_v56  ;;  %v439_v37 = vmax.f32 %v351_v33, 0.0  ;;  %v553_v61 = vadd.f32 %v552_v0, %v431_v14  ;;  %v232_v11 = vmul.f32 %v809_v54, %v795_v41 }
  0xb0   :  { %v547_v2 = vadd.f32 %v546_v32, %v462_v3  ;;  %v375_v35 = vadd.f32 %v778_v19, %v267_v29  ;;  %v447_v28 = vmax.f32 %v359_v47, 0.0  ;;  %vm565_vm10 = vweird.f32 %v664_v58 }
  0xb1   :  { %v563_v27 = vmul.f32 %v664_v58, %v562_v42  ;;  %v554_v52 = vadd.f32 %v553_v61, %v439_v37  ;;  %v240_v48 = vmul.f32 %v809_v54, %v800_v46  ;;  %v332_v34 = vadd.f32 %v782_v23, %v224_v12 }
  0xb2   :  { %v548_v21 = vadd.f32 %v547_v2, %v470_v31  ;;  %v383_v26 = vadd.f32 %v778_v19, %v275_v24  ;;  %v391_v33 = vadd.f32 %v778_v19, %v283_v62  ;;  %v455_v25 = vmax.f32 %v367_v63, 0.0 }
  0xb3   :  { %v564_v22 = vadd.f32 %v664_v58, %v563_v27  ;;  %v555_v56 = vadd.f32 %v554_v52, %v447_v28  ;;  %v248_v3 = vmul.f32 %v809_v54, %v806_v51  ;;  %v340_v29 = vadd.f32 %v782_v23, %v232_v11 }
  0xb4   :  { %v549_v47 = vadd.f32 %v548_v21, %v478_v20  ;;  %v463_v0 = vmax.f32 %v375_v35, 0.0  ;;  %v256_v12 = vmul.f32 %v809_v54, %v815_v57  ;;  %v348_v32 = vadd.f32 %v782_v23, %v240_v48 }
  0xb5   :  { %v1022_v14 = vsel %vm565_vm10, %v664_v58, %v564_v22  ;;  %v556_v31 = vadd.f32 %v555_v56, %v455_v25  ;;  %v420_v42 = vmax.f32 %v332_v34, 0.0  ;;  %v1213_v19 = vmax.f32 %v930_v17, 0.0 }
  0xb6   :  { %v573_v62 = vmul.f32 %v1022_v14, %v549_v47  ;;  %v471_v63 = vmax.f32 %v383_v26, 0.0  ;;  %v272_v37 = vmul.f32 %v809_v54, %v829_v4  ;;  %v225_v58 = vmul.f32 %v809_v54, %v792_v39 }
  0xb7   :  { %v521_v24 = vadd.f32 %v520_v30, %v1213_v19  ;;  %v557_v20 = vadd.f32 %v556_v31, %v463_v0  ;;  %v356_v61 = vadd.f32 %v782_v23, %v248_v3  ;;  %v428_v11 = vmax.f32 %v340_v29, 0.0 }
  0xb8   :  { %598 = vmatpush.msra.mxu2 %v573_v62  ;;  %v479_v27 = vmax.f32 %v391_v33, 0.0  ;;  %v280_v17 = vmul.f32 %v809_v54, %v836_v9  ;;  %v364_v30 = vadd.f32 %v782_v23, %v256_v12  ;;  %v233_v35 = vmul.f32 %v809_v54, %v798_v45 }
  0xb9   :  { %v522_v2 = vadd.f32 %v521_v24, %v420_v42  ;;  %v558_v28 = vadd.f32 %v557_v20, %v471_v63  ;;  %v372_v52 = vadd.f32 %v782_v23, %v877_v43  ;;  %v436_v48 = vmax.f32 %v348_v32, 0.0 }
  0xba   :  { %v1214_v21 = vmax.f32 %v889_v53, 0.0  ;;  %v1215_v22 = vmax.f32 %v907_v5, 0.0  ;;  %v1216_v33 = vmax.f32 %v895_v60, 0.0  ;;  %v1217_v25 = vmax.f32 %v913_v7, 0.0 }
  0xbb   :  { %v523_v34 = vadd.f32 %v522_v2, %v428_v11  ;;  %v241_v3 = vmul.f32 %v809_v54, %v804_v50  ;;  %v333_v29 = vadd.f32 %v782_v23, %v225_v58  ;;  %v559_v47 = vadd.f32 %v558_v28, %v479_v27 }
  0xbc   :  { %v1046_v26 = vadd.f32 %v1215_v22, %v1214_v21  ;;  %v530_v56 = vadd.f32 %v1217_v25, %v1216_v33  ;;  %v380_v43 = vadd.f32 %v782_v23, %v272_v37  ;;  %v444_v0 = vmax.f32 %v356_v61, 0.0 }
  0xbd   :  { %v524_v12 = vadd.f32 %v523_v34, %v436_v48  ;;  %v388_v53 = vadd.f32 %v782_v23, %v280_v17  ;;  %v452_v5 = vmax.f32 %v364_v30, 0.0  ;;  %v249_v31 = vmul.f32 %v809_v54, %v811_v55 }
  0xbe   :  { %v341_v60 = vadd.f32 %v782_v23, %v233_v35  ;;  %v574_v7 = vmul.f32 %v1022_v14, %v559_v47  ;;  %v460_v32 = vmax.f32 %v372_v52, 0.0  ;;  %v257_v19 = vmul.f32 %v809_v54, %v987_v6 }
  0xbf   :  { %v525_v42 = vadd.f32 %v524_v12, %v444_v0  ;;  %v349_v24 = vadd.f32 %v782_v23, %v241_v3  ;;  %v421_v62 = vmax.f32 %v333_v29, 0.0  ;;  %v1218_v63 = vmax.f32 %v933_v18, 0.0 }
  0xc0   :  { %v222_v58 = vmul.f32 %v802_v49, %v790_v38  ;;  %618 = vmatpush.msra.mxu3 %v574_v7  ;;  %v468_v20 = vmax.f32 %v380_v43, 0.0  ;;  %v273_v11 = vmul.f32 %v809_v54, %v834_v8  ;;  %v230_v2 = vmul.f32 %v802_v49, %v795_v41 }
  0xc1   :  { %v531_v37 = vadd.f32 %v530_v56, %v1218_v63  ;;  %v526_v61 = vadd.f32 %v525_v42, %v452_v5  ;;  %v281_v27 = vmul.f32 %v809_v54, %v838_v10  ;;  %v357_v17 = vadd.f32 %v782_v23, %v249_v31 }
  0xc2   :  { %v429_v30 = vmax.f32 %v341_v60, 0.0  ;;  %v476_v35 = vmax.f32 %v388_v53, 0.0  ;;  %v238_v52 = vmul.f32 %v802_v49, %v800_v46  ;;  %v330_v48 = vadd.f32 %v869_v40, %v222_v58 }
  0xc3   :  { %v532_v18 = vadd.f32 %v531_v37, %v421_v62  ;;  %v527_v28 = vadd.f32 %v526_v61, %v460_v32  ;;  %v365_v34 = vadd.f32 %v782_v23, %v257_v19  ;;  %v373_v21 = vadd.f32 %v782_v23, %v881_v44 }
  0xc4   :  { %v437_v22 = vmax.f32 %v349_v24, 0.0  ;;  %v381_v54 = vadd.f32 %v782_v23, %v273_v11  ;;  %v246_v56 = vmul.f32 %v802_v49, %v806_v51  ;;  %v338_v3 = vadd.f32 %v869_v40, %v230_v2 }
  0xc5   :  { %v533_v33 = vadd.f32 %v532_v18, %v429_v30  ;;  %v528_v25 = vadd.f32 %v527_v28, %v468_v20  ;;  %v389_v29 = vadd.f32 %v782_v23, %v281_v27  ;;  %v445_v47 = vmax.f32 %v357_v17, 0.0 }
  0xc6   :  { %v254_v0 = vmul.f32 %v802_v49, %v815_v57  ;;  %v346_v44 = vadd.f32 %v869_v40, %v238_v52  ;;  %v418_v53 = vmax.f32 %v330_v48, 0.0  ;;  %v1219_v5 = vmax.f32 %v924_v15, 0.0 }
  0xc7   :  { %v534_v43 = vadd.f32 %v533_v33, %v437_v22  ;;  %v529_v12 = vadd.f32 %v528_v25, %v476_v35  ;;  %v453_v60 = vmax.f32 %v365_v34, 0.0  ;;  %v461_v7 = vmax.f32 %v373_v21, 0.0 }
  0xc8   :  { %v501_v31 = vadd.f32 %v992_v13, %v1219_v5  ;;  %v223_v42 = vmul.f32 %v802_v49, %v792_v39  ;;  %v354_v19 = vadd.f32 %v869_v40, %v246_v56  ;;  %v426_v24 = vmax.f32 %v338_v3, 0.0 }
  0xc9   :  { %v535_v32 = vadd.f32 %v534_v43, %v445_v47  ;;  %v571_v23 = vmul.f32 %v1022_v14, %v529_v12  ;;  %v270_v37 = vmul.f32 %v802_v49, %v829_v4  ;;  %v278_v15 = vmul.f32 %v802_v49, %v836_v9 }
  0xca   :  { %v502_v62 = vadd.f32 %v501_v31, %v418_v53  ;;  %v231_v13 = vmul.f32 %v802_v49, %v798_v45  ;;  %v362_v58 = vadd.f32 %v869_v40, %v254_v0  ;;  %v434_v20 = vmax.f32 %v346_v44, 0.0 }
  0xcb   :  { %v536_v63 = vadd.f32 %v535_v32, %v453_v60  ;;  %599 = vmatpush.msra.mxu2 %v571_v23  ;;  %v239_v11 = vmul.f32 %v802_v49, %v804_v50  ;;  %v469_v2 = vmax.f32 %v381_v54, 0.0  ;;  %v477_v27 = vmax.f32 %v389_v29, 0.0 }
  0xcc   :  { %v503_v61 = vadd.f32 %v502_v62, %v426_v24  ;;  %v331_v30 = vadd.f32 %v869_v40, %v223_v42  ;;  %v370_v18 = vadd.f32 %v869_v40, %v867_v36  ;;  %v442_v35 = vmax.f32 %v354_v19, 0.0  ;;  %v1221_v24 = vld [vmem:[#allocation5_spill] sm:$0xff] }
  0xcd   :  { %v537_v17 = vadd.f32 %v536_v63, %v461_v7  ;;  %v247_v52 = vmul.f32 %v802_v49, %v811_v55  ;;  %v378_v34 = vadd.f32 %v869_v40, %v270_v37  ;;  %v386_v21 = vadd.f32 %v869_v40, %v278_v15  ;;  %v1222_v15 = vld [vmem:[#allocation7_spill] sm:$0xff] }
  0xce   :  { %v504_v28 = vadd.f32 %v503_v61, %v434_v20  ;;  %v339_v22 = vadd.f32 %v869_v40, %v231_v13  ;;  %v450_v33 = vmax.f32 %v362_v58, 0.0  ;;  %v255_v54 = vmul.f32 %v802_v49, %v987_v6 }
  0xcf   :  { %v538_v48 = vadd.f32 %v537_v17, %v469_v2  ;;  %v347_v56 = vadd.f32 %v869_v40, %v239_v11  ;;  %v419_v3 = vmax.f32 %v331_v30, 0.0  ;;  %v1220_v29 = vmax.f32 %v927_v16, 0.0 }
  0xd0   :  { %v505_v25 = vadd.f32 %v504_v28, %v442_v35  ;;  %v220_v43 = vmul.f32 %v821_v59, %v790_v38  ;;  %v458_v0 = vmax.f32 %v370_v18, 0.0  ;;  %v271_v44 = vmul.f32 %v802_v49, %v834_v8  ;;  %v1223_v18 = vld [vmem:[#allocation8_spill] sm:$0xff]  ;;  %v1225_v28 = vld [vmem:[#allocation10_spill] sm:$0xff] }
  0xd1   :  { %v539_v36 = vadd.f32 %v538_v48, %v477_v27  ;;  %v511_v47 = vadd.f32 %v1046_v26, %v1220_v29  ;;  %v355_v53 = vadd.f32 %v869_v40, %v247_v52  ;;  %v427_v31 = vmax.f32 %v339_v22, 0.0 }
  0xd2   :  { %v506_v12 = vadd.f32 %v505_v25, %v450_v33  ;;  %v228_v7 = vmul.f32 %v821_v59, %v795_v41  ;;  %v466_v16 = vmax.f32 %v378_v34, 0.0  ;;  %v363_v26 = vadd.f32 %v869_v40, %v255_v54 }
  0xd3   :  { %v572_v5 = vmul.f32 %v1022_v14, %v539_v36  ;;  %v512_v60 = vadd.f32 %v511_v47, %v419_v3  ;;  %v236_v38 = vmul.f32 %v821_v59, %v800_v46  ;;  %v474_v42 = vmax.f32 %v386_v21, 0.0 }
  0xd4   :  { %v507_v32 = vadd.f32 %v506_v12, %v458_v0  ;;  %v435_v23 = vmax.f32 %v347_v56, 0.0  ;;  %v328_v62 = vadd.f32 %v1221_v24, %v220_v43  ;;  %v279_v37 = vmul.f32 %v802_v49, %v838_v10 }
  0xd5   :  { %619 = vmatpush.msra.mxu3 %v572_v5  ;;  %v513_v19 = vadd.f32 %v512_v60, %v427_v31  ;;  %v371_v41 = vadd.f32 %v869_v40, %v1222_v15  ;;  %v244_v13 = vmul.f32 %v821_v59, %v806_v51  ;;  %v379_v58 = vadd.f32 %v869_v40, %v271_v44 }
  0xd6   :  { %v508_v63 = vadd.f32 %v507_v32, %v466_v16  ;;  %v443_v20 = vmax.f32 %v355_v53, 0.0  ;;  %v336_v61 = vadd.f32 %v1221_v24, %v228_v7  ;;  %v451_v2 = vmax.f32 %v363_v26, 0.0 }
  0xd7   :  { %v514_v46 = vadd.f32 %v513_v19, %v435_v23  ;;  %v252_v27 = vmul.f32 %v821_v59, %v815_v57  ;;  %v344_v17 = vadd.f32 %v1221_v24, %v236_v38  ;;  %v416_v30 = vmax.f32 %v328_v62, 0.0  ;;  %v1229_v19 = vld [vmem:[#allocation11_spill] sm:$0xff] }
  0xd8   :  { %v509_v11 = vadd.f32 %v508_v63, %v474_v42  ;;  %v1224_v35 = vmax.f32 %v1223_v18, 0.0  ;;  %v221_v51 = vmul.f32 %v821_v59, %v792_v39  ;;  %v387_v34 = vadd.f32 %v869_v40, %v279_v37  ;;  %v1227_v42 = vld [vmem:[#allocation9_spill] sm:$0xff] }
  0xd9   :  { %v515_v49 = vadd.f32 %v514_v46, %v443_v20  ;;  %v459_v21 = vmax.f32 %v371_v41, 0.0  ;;  %v352_v22 = vadd.f32 %v1221_v24, %v244_v13  ;;  %v424_v57 = vmax.f32 %v336_v61, 0.0 }
  0xda   :  { %v481_v52 = vadd.f32 %v1225_v28, %v1224_v35  ;;  %v569_v48 = vmul.f32 %v1022_v14, %v509_v11  ;;  %v229_v54 = vmul.f32 %v821_v59, %v798_v45  ;;  %v467_v56 = vmax.f32 %v379_v58, 0.0  ;;  %v1226_v45 = vld [vmem:[#allocation6_spill] sm:$0xff] }
  0xdb   :  { %v516_v33 = vadd.f32 %v515_v49, %v451_v2  ;;  %v268_v36 = vmul.f32 %v821_v59, %v829_v4  ;;  %v360_v39 = vadd.f32 %v1221_v24, %v252_v27  ;;  %v237_v3 = vmul.f32 %v821_v59, %v804_v50 }
  0xdc   :  { %v482_v25 = vadd.f32 %v481_v52, %v416_v30  ;;  %600 = vmatpush.msra.mxu2 %v569_v48  ;;  %v432_v29 = vmax.f32 %v344_v17, 0.0  ;;  %v329_v43 = vadd.f32 %v1221_v24, %v221_v51  ;;  %v475_v0 = vmax.f32 %v387_v34, 0.0 }
  0xdd   :  { %v517_v40 = vadd.f32 %v516_v33, %v459_v21  ;;  %v276_v12 = vmul.f32 %v821_v59, %v836_v9  ;;  %v368_v44 = vadd.f32 %v1221_v24, %v1226_v45  ;;  %v245_v4 = vmul.f32 %v821_v59, %v811_v55 }
  0xde   :  { %v483_v47 = vadd.f32 %v482_v25, %v424_v57  ;;  %v440_v5 = vmax.f32 %v352_v22, 0.0  ;;  %v337_v50 = vadd.f32 %v1221_v24, %v229_v54  ;;  %v376_v60 = vadd.f32 %v1221_v24, %v268_v36 }
  0xdf   :  { %v518_v53 = vadd.f32 %v517_v40, %v467_v56  ;;  %v448_v7 = vmax.f32 %v360_v39, 0.0  ;;  %v253_v16 = vmul.f32 %v821_v59, %v987_v6  ;;  %v345_v32 = vadd.f32 %v1221_v24, %v237_v3 }
  0xe0   :  { %v484_v31 = vadd.f32 %v483_v47, %v432_v29  ;;  %v417_v38 = vmax.f32 %v329_v43, 0.0  ;;  %v1228_v23 = vmax.f32 %v1227_v42, 0.0  ;;  %v261_v62 = vmul.f32 %v821_v59, %v825_v1 }
  0xe1   :  { %v519_v9 = vadd.f32 %v518_v53, %v475_v0  ;;  %v384_v63 = vadd.f32 %v1221_v24, %v276_v12  ;;  %v456_v37 = vmax.f32 %v368_v44, 0.0  ;;  %v353_v15 = vadd.f32 %v1221_v24, %v245_v4 }
  0xe2   :  { %v485_v26 = vadd.f32 %v484_v31, %v440_v5  ;;  %v491_v55 = vadd.f32 %v1229_v19, %v1228_v23  ;;  %v425_v13 = vmax.f32 %v337_v50, 0.0  ;;  %v464_v20 = vmax.f32 %v376_v60, 0.0 }
  0xe3   :  { %v570_v41 = vmul.f32 %v1022_v14, %v519_v9  ;;  %v269_v46 = vmul.f32 %v821_v59, %v834_v8  ;;  %v361_v11 = vadd.f32 %v1221_v24, %v253_v16  ;;  %v433_v2 = vmax.f32 %v345_v32, 0.0 }
  0xe4   :  { %v486_v6 = vadd.f32 %v485_v26, %v448_v7  ;;  %v492_v58 = vadd.f32 %v491_v55, %v417_v38  ;;  %v472_v27 = vmax.f32 %v384_v63, 0.0  ;;  %v277_v17 = vmul.f32 %v821_v59, %v838_v10  ;;  %v575_v59 = vld [vmem:[%s1197_s4] sm:$0xf] }
  0xe5   :  { %620 = vmatpush.msra.mxu3 %v570_v41  ;;  %v369_v30 = vadd.f32 %v1221_v24, %v261_v62  ;;  %v441_v18 = vmax.f32 %v353_v15, 0.0  ;;  %v377_v52 = vadd.f32 %v1221_v24, %v269_v46  ;;  %v449_v51 = vmax.f32 %v361_v11, 0.0 }
  0xe6   :  { %v487_v61 = vadd.f32 %v486_v6, %v456_v37  ;;  %v493_v1 = vadd.f32 %v492_v58, %v425_v13  ;;  %v385_v48 = vadd.f32 %v1221_v24, %v277_v17  ;;  %v580_v24 = vpop.permute.xlu2 %579 }
  0xe7   :  { %v457_v21 = vmax.f32 %v369_v30, 0.0  ;;  %v465_v10 = vmax.f32 %v377_v52, 0.0 }
  0xe8   :  { %v488_v49 = vadd.f32 %v487_v61, %v464_v20  ;;  %v494_v35 = vadd.f32 %v493_v1, %v433_v2  ;;  %v473_v57 = vmax.f32 %v385_v48, 0.0 }
  0xea   :  { %v489_v28 = vadd.f32 %v488_v49, %v472_v27  ;;  %v495_v8 = vadd.f32 %v494_v35, %v441_v18 }
  0xec   :  { %v567_v34 = vmul.f32 %v1022_v14, %v489_v28  ;;  %v496_v22 = vadd.f32 %v495_v8, %v449_v51 }
  0xee   :  { %601 = vmatpush.msra.mxu2 %v567_v34  ;;  %v497_v33 = vadd.f32 %v496_v22, %v457_v21 }
  0xef   :  { %655 = vmatmul.msk.f32.vlgmr.msra.gmra.mxu2 %vm582_vm11, %v575_v59 }
  0xf0   :  { %v498_v25 = vadd.f32 %v497_v33, %v465_v10 }
  0xf2   :  { %v499_v54 = vadd.f32 %v498_v25, %v473_v57 }
  0xf4   :  { %v568_v56 = vmul.f32 %v1022_v14, %v499_v54 }
  0xf6   :  { %621 = vmatpush.msra.mxu3 %v568_v56 }
  0xf7   :  { %656 = vmatmul.msk.f32.vlgmr.msra.gmra.mxu3 %vm582_vm11, %v575_v59 }
 0x172   :  { %v603_v36 = vpop.f32.mrf.mxu2 }
 0x173   :  { %v604_v40 = vadd.f32 %v603_v36, %v580_v24 }
 0x17a   :  { %v623_v39 = vpop.f32.mrf.mxu3 }
 0x17b   :  { %v624_v3 = vadd.f32 %v623_v39, %v580_v24 }
 0x17d   :  { %v628_v29 = vrot.slane %v624_v3, 4 }
 0x17f   :  { %v630_v47 = vsel %vm629_vm12, %v604_v40, %v628_v29 }
 0x180   :  { %632 = vst [vmem:[#allocation2] sm:$0xff] %v630_v47 }
 0x181   :  { %643 = dma.vmem_to_hbm [thread:$0]  %s639_s25, 128, %s641_s27, [#allocation3]  }
 0x182   :  { %689 = dma.done.wait [#allocation3], 128  }
 0x183   :  { %690 = vsyncadd [#allocation3], 4294967168 }
 0x184   :  { %648 = vsyncpa [#allocation3], 1 }

</bundles_post_ra>
